<compile_context>
chip_gen: v5e
topology: v5e:2x2
jax: 0.10.0
libtpu: 0.0.40
codegen_flags: <defaults>
</compile_context>

<pallas_src>
import functools

import jax
import jax.numpy as jnp
from jax.experimental import pallas as pl
from jax.experimental.pallas import tpu as pltpu

_ONES_BLOCK = 128  # lane-width block of constant ones carrying the deg-0 term


def _round_up(x, m):
    return ((x + m - 1) // m) * m


def _vmem_capacity_bytes():
    """Physical per-core VMEM; conservative fallback if the query fails."""
    try:
        info = pltpu.get_tpu_info()
        cap = getattr(info, "vmem_capacity_bytes", None)
        if cap:
            return int(cap)
    except Exception:
        pass
    return 64 * 1024 * 1024  # v7x-sized fallback (smallest current gen)


def _kacn_kernel(x_ref, coeffs_ref, o_ref, feats_ref):
    # x_ref:      (TB, I_pad)  batch tile of inputs (f32, zero-padded columns)
    # coeffs_ref: (K, TO)      [degree-1..D slabs | 128-row bias block]
    # o_ref:      (TB, TO)
    # feats_ref:  (TB, K)      VMEM scratch: [T_1 | T_2 | ... | T_D | ones]
    tb, i_pad = x_ref.shape
    k_total = feats_ref.shape[1]
    n_deg = (k_total - _ONES_BLOCK) // i_pad  # number of degrees >= 1

    if n_deg >= 1:
        t = jnp.tanh(x_ref[...].astype(jnp.float32))  # T_1(t) = t
        t_km1 = jnp.ones_like(t)                      # T_0
        t_k = t
        feats_ref[:, 0:i_pad] = t_k.astype(feats_ref.dtype)
        for d in range(2, n_deg + 1):                 # tiny static unroll
            t_next = 2.0 * t * t_k - t_km1            # Chebyshev recurrence
            feats_ref[:, (d - 1) * i_pad:d * i_pad] = t_next.astype(
                feats_ref.dtype)
            t_km1, t_k = t_k, t_next

    # Constant-ones block carries the degree-0 (bias) contribution.
    feats_ref[:, n_deg * i_pad:n_deg * i_pad + _ONES_BLOCK] = jnp.ones(
        (tb, _ONES_BLOCK), feats_ref.dtype)

    # Single fused MXU matmul over K, f32 accumulation.
    o_ref[...] = jnp.dot(feats_ref[...], coeffs_ref[...],
                         preferred_element_type=jnp.float32).astype(o_ref.dtype)


@functools.partial(jax.jit,
                   static_argnames=("tile_b", "tile_o", "matmul_dtype"))
def cheby_kan_layer(x, cheby_coeffs, *, tile_b=512, tile_o=512,
                    matmul_dtype=jnp.bfloat16):
    """x: (..., input_dim);  cheby_coeffs: (input_dim, output_dim, degree+1).

    Returns (prod(leading dims), output_dim), matching torch's y.view(-1, outdim).
    """
    assert tile_b % 16 == 0, "tile_b must be a multiple of 16"
    assert tile_o % 128 == 0, "tile_o must be a multiple of 128 (lane)"

    input_dim, output_dim, deg_p1 = cheby_coeffs.shape
    degree = deg_p1 - 1

    x2 = x.reshape(-1, input_dim).astype(jnp.float32)
    batch = x2.shape[0]

    i_pad = _round_up(input_dim, 128)
    k_total = degree * i_pad + _ONES_BLOCK
    dt_bytes = jnp.dtype(matmul_dtype).itemsize

    # ---- generation-aware VMEM budgeting & tile sizing ----------------------
    vmem_cap = _vmem_capacity_bytes()
    budget = (vmem_cap * 3) // 5                      # ~60% for our buffers
    vmem_limit = min((vmem_cap * 3) // 4, vmem_cap - (16 << 20))
    vmem_limit = max(int(vmem_limit), 32 << 20)

    def working_set(tb, to):
        return (2 * tb * i_pad * 4                    # x (f32, double-buffered)
                + 2 * k_total * to * dt_bytes         # coeffs (double-buffered)
                + 2 * tb * to * 4                     # out (f32, double-buffered)
                + tb * k_total * dt_bytes)            # feats scratch

    tile_b_eff = min(tile_b, _round_up(batch, 16))
    if batch >= 32:
        # Keep >= 2 batch tiles so both TensorCores (v7x megacore) get work.
        tile_b_eff = min(tile_b_eff, _round_up((batch + 1) // 2, 16))

    o_pad_full = _round_up(output_dim, 128)
    if working_set(tile_b_eff, o_pad_full) <= budget:
        tile_o_eff = o_pad_full                       # whole weight slab resident
    else:
        tile_o_eff = min(tile_o, o_pad_full)
    while working_set(tile_b_eff, tile_o_eff) > budget and tile_b_eff > 16:
        tile_b_eff = max(16, _round_up(tile_b_eff // 2, 16))

    o_pad = _round_up(output_dim, tile_o_eff)
    b_pad = _round_up(batch, tile_b_eff)

    # ---- operand packing -----------------------------------------------------
    cc = cheby_coeffs.astype(jnp.float32)
    if degree > 0:
        # coeffs_flat[(d-1)*I_pad + i, o] = coeffs[i, o, d]   (zero-padded in i)
        cf = jnp.transpose(cc[:, :, 1:], (2, 0, 1))                     # (D, I, O)
        cf = jnp.pad(cf, ((0, 0), (0, i_pad - input_dim), (0, 0)))      # (D, I_pad, O)
        cf = cf.reshape(degree * i_pad, output_dim)
    else:
        cf = jnp.zeros((0, output_dim), jnp.float32)
    # Degree-0 term (T_0 == 1) folded into the matmul via a 128-row block whose
    # first row is the bias; the matching feature columns are constant ones.
    bias = jnp.sum(cc[:, :, 0], axis=0)                                 # (O,)
    bias_block = jnp.zeros((_ONES_BLOCK, output_dim), jnp.float32).at[0].set(bias)
    coeffs_flat = jnp.concatenate([cf, bias_block], axis=0)             # (K, O)
    coeffs_flat = jnp.pad(
        coeffs_flat, ((0, 0), (0, o_pad - output_dim))).astype(matmul_dtype)

    x2p = jnp.pad(x2, ((0, b_pad - batch), (0, i_pad - input_dim)))

    grid = (o_pad // tile_o_eff, b_pad // tile_b_eff)   # out OUTER, batch INNER

    cost = pl.CostEstimate(
        flops=2 * b_pad * k_total * o_pad,
        transcendentals=b_pad * i_pad,
        bytes_accessed=(b_pad * i_pad * 4
                        + k_total * o_pad * dt_bytes
                        + b_pad * o_pad * 4),
    )

    out = pl.pallas_call(
        _kacn_kernel,
        out_shape=jax.ShapeDtypeStruct((b_pad, o_pad), jnp.float32),
        grid_spec=pltpu.PrefetchScalarGridSpec(
            num_scalar_prefetch=0,
            grid=grid,
            in_specs=[
                # batch tile changes along the inner (batch) axis only
                pl.BlockSpec((tile_b_eff, i_pad), lambda j, i: (i, 0)),
                # weight tile is constant along the inner axis -> DMA'd once per
                # out tile (exactly once total when tile_o_eff == o_pad)
                pl.BlockSpec((k_total, tile_o_eff), lambda j, i: (0, j)),
            ],
            out_specs=pl.BlockSpec((tile_b_eff, tile_o_eff),
                                   lambda j, i: (i, j)),
            scratch_shapes=[pltpu.VMEM((tile_b_eff, k_total), matmul_dtype)],
        ),
        compiler_params=pltpu.CompilerParams(
            dimension_semantics=("arbitrary", "parallel"),
            vmem_limit_bytes=int(vmem_limit),
        ),
        cost_estimate=cost,
    )(x2p, coeffs_flat)

    return out[:batch, :output_dim]


def _reference(x, cheby_coeffs):
    """Direct transcription of the torch forward (arccos / cos form)."""
    input_dim, output_dim, deg_plus1 = cheby_coeffs.shape
    x2 = x.reshape(-1, input_dim)
    t = jnp.tanh(x2)[..., None]                                   # (B, I, 1)
    theta = jnp.arccos(t)                                         # (B, I, 1)
    d = jnp.arange(deg_plus1, dtype=jnp.float32)                  # (D+1,)
    feats = jnp.cos(theta * d)                                    # (B, I, D+1)
    return jnp.einsum("bid,iod->bo", feats, cheby_coeffs)


if __name__ == "__main__":
    key = jax.random.PRNGKey(0)
    k_x, k_w = jax.random.split(key)

    batch = 64
    input_dim = 32
    output_dim = 16
    degree = 3

    x = jax.random.normal(k_x, (batch, input_dim), dtype=jnp.float32)
    std = 1.0 / (input_dim * (degree + 1))
    cheby_coeffs = std * jax.random.normal(
        k_w, (input_dim, output_dim, degree + 1), dtype=jnp.float32)

    y_ref = _reference(x, cheby_coeffs)

    # Exact path (f32 MXU inputs) -- tight check against the torch-equivalent.
    y32 = jax.block_until_ready(
        cheby_kan_layer(x, cheby_coeffs, matmul_dtype=jnp.float32))
    assert y32.shape == (batch, output_dim)
    assert jnp.allclose(y32, y_ref, atol=1e-5, rtol=1e-5), "f32 mismatch vs reference"

    # Fast default path (bf16 MXU inputs, f32 accumulation) -- loose tolerance.
    ybf = jax.block_until_ready(cheby_kan_layer(x, cheby_coeffs))
    assert ybf.shape == (batch, output_dim)
    assert jnp.allclose(ybf, y_ref, atol=1e-2, rtol=1e-1), "bf16 mismatch vs reference"

    print("KERNEL_OK")
</pallas_src>

<mosaic_0001>
module attributes {stable_mosaic.version = 11 : i64} {
  func.func @_kacn_kernel(%arg0: i32, %arg1: i32, %arg2: memref<32x128xf32, #tpu.memory_space<vmem>>, %arg3: memref<512x128xf32, #tpu.memory_space<vmem>>, %arg4: memref<32x128xf32, #tpu.memory_space<vmem>>, %arg5: memref<32x512xf32, #tpu.memory_space<vmem>>) attributes {dimension_semantics = [#tpu.dimension_semantics<arbitrary>, #tpu.dimension_semantics<parallel>], iteration_bounds = array<i64: 1, 2>, scalar_prefetch = 0 : i64, scratch_operands = 1 : i64, tpu.core_type = #tpu.core_type<tc>, window_params = [{transform_indices = @transform_0, window_bounds = array<i64: 32, 128>}, {transform_indices = @transform_1, window_bounds = array<i64: 512, 128>}, {transform_indices = @transform_2, window_bounds = array<i64: 32, 128>}]} {
    %c0 = arith.constant 0 : index
    %c0_0 = arith.constant 0 : index
    %0 = vector.load %arg2[%c0, %c0_0] : memref<32x128xf32, #tpu.memory_space<vmem>>, vector<32x128xf32>
    %1 = math.tanh %0 : vector<32x128xf32>
    %cst = arith.constant 1.000000e+00 : f32
    %2 = vector.broadcast %cst : f32 to vector<32x128xf32>
    %c0_1 = arith.constant 0 : index
    %c0_2 = arith.constant 0 : index
    %3 = vector.load %arg5[%c0_1, %c0_2] : memref<32x512xf32, #tpu.memory_space<vmem>>, vector<32x128xf32>
    tpu.vector_store %arg5[%c0_1, %c0_2], %1 {strides = array<i32>} : memref<32x512xf32, #tpu.memory_space<vmem>>, vector<32x128xf32>,
    %cst_3 = arith.constant 2.000000e+00 : f32
    %4 = vector.broadcast %cst_3 : f32 to vector<32x128xf32>
    %5 = arith.mulf %4, %1 : vector<32x128xf32>
    %6 = arith.mulf %5, %1 : vector<32x128xf32>
    %7 = arith.subf %6, %2 : vector<32x128xf32>
    %c0_4 = arith.constant 0 : index
    %c128 = arith.constant 128 : index
    %8 = vector.load %arg5[%c0_4, %c128] : memref<32x512xf32, #tpu.memory_space<vmem>>, vector<32x128xf32>
    tpu.vector_store %arg5[%c0_4, %c128], %7 {strides = array<i32>} : memref<32x512xf32, #tpu.memory_space<vmem>>, vector<32x128xf32>,
    %cst_5 = arith.constant 2.000000e+00 : f32
    %9 = vector.broadcast %cst_5 : f32 to vector<32x128xf32>
    %10 = arith.mulf %9, %1 : vector<32x128xf32>
    %11 = arith.mulf %10, %7 : vector<32x128xf32>
    %12 = arith.subf %11, %1 : vector<32x128xf32>
    %c0_6 = arith.constant 0 : index
    %c256 = arith.constant 256 : index
    %13 = vector.load %arg5[%c0_6, %c256] : memref<32x512xf32, #tpu.memory_space<vmem>>, vector<32x128xf32>
    tpu.vector_store %arg5[%c0_6, %c256], %12 {strides = array<i32>} : memref<32x512xf32, #tpu.memory_space<vmem>>, vector<32x128xf32>,
    %cst_7 = arith.constant 1.000000e+00 : f32
    %14 = vector.broadcast %cst_7 : f32 to vector<32x128xf32>
    %c0_8 = arith.constant 0 : index
    %c384 = arith.constant 384 : index
    %15 = vector.load %arg5[%c0_8, %c384] : memref<32x512xf32, #tpu.memory_space<vmem>>, vector<32x128xf32>
    tpu.vector_store %arg5[%c0_8, %c384], %14 {strides = array<i32>} : memref<32x512xf32, #tpu.memory_space<vmem>>, vector<32x128xf32>,
    %c0_9 = arith.constant 0 : index
    %c0_10 = arith.constant 0 : index
    %16 = vector.load %arg5[%c0_9, %c0_10] : memref<32x512xf32, #tpu.memory_space<vmem>>, vector<32x512xf32>
    %c0_11 = arith.constant 0 : index
    %c0_12 = arith.constant 0 : index
    %17 = vector.load %arg3[%c0_11, %c0_12] : memref<512x128xf32, #tpu.memory_space<vmem>>, vector<512x128xf32>
    %cst_13 = arith.constant dense<0.000000e+00> : vector<32x128xf32>
    %18 = tpu.matmul %16, %17, %cst_13 {dimension_numbers = #tpu.dot_dimension_numbers<[1], [0], [0], [1], [0, 0, 1, 1], [], []>} : vector<32x512xf32>, vector<512x128xf32>, vector<32x128xf32> -> vector<32x128xf32>
    %c0_14 = arith.constant 0 : index
    %c0_15 = arith.constant 0 : index
    %19 = vector.load %arg4[%c0_14, %c0_15] : memref<32x128xf32, #tpu.memory_space<vmem>>, vector<32x128xf32>
    tpu.vector_store %arg4[%c0_14, %c0_15], %18 {strides = array<i32>} : memref<32x128xf32, #tpu.memory_space<vmem>>, vector<32x128xf32>,
    return
  }
  func.func @transform_0(%arg0: i32, %arg1: i32) -> (i32, i32) {
    %c0_i32 = arith.constant 0 : i32
    %c0_i32_0 = arith.constant 0 : i32
    return %arg1, %c0_i32 : i32, i32
  }
  func.func @transform_1(%arg0: i32, %arg1: i32) -> (i32, i32) {
    %c0_i32 = arith.constant 0 : i32
    %c0_i32_0 = arith.constant 0 : i32
    return %c0_i32, %arg0 : i32, i32
  }
  func.func @transform_2(%arg0: i32, %arg1: i32) -> (i32, i32) {
    %c0_i32 = arith.constant 0 : i32
    return %arg1, %arg0 : i32, i32
  }
}

</mosaic_0001>

<bundles_post_ra>
// kernel: cheby_kan_layer.1
= control target key start
LH: loop header
LB: loop body
LE: loop exit
PB: predicated region body
PF: predicated region fallthrough
CT: control target
= control target key end

     0   :  { %s607_s9 = smov 0   ;;  %s609_s10 = smov 0   ;;  %s858_s0 = inlined_call_operand.vmem [shape: f32[64,128], index: 0, kind: input, shape index: {}]   ;;  %s859_s1 = inlined_call_operand.vmem [shape: f32[512,128], index: 1, kind: input, shape index: {}]   ;;  %s860_s2 = inlined_call_operand.vmem [shape: f32[64,128], index: 2, kind: output, shape index: {}]  }
   0x1   :  { %s611_s11 = smov 0  }
   0x2 LB: > { %s21_s12 = sadd.s32 1, %s585_s10  ;;  %p523_p0 = scmp.ge.s32.totalorder %s589_s11, 1  ;;  %s589_s11 = sphi %s611_s11, %s12_s11   ;;  %s585_s10 = sphi %s609_s10, %s863_s10   ;;  %s581_s9 = sphi %s607_s9, %s862_s9  }
   0x3   : > { %p22_p1 = scmp.ge.s32.totalorder %s21_s12, 2  ;;  %p136_p2 = scmp.lt.s32.totalorder %s589_s11, 3 }
   0x5   : > { %s865_s12 = smov (%p22_p1, %s21_s12), 0  ;;  %p137_p3 = pnand %p523_p0, %p136_p2 }
   0x6   : > { %s524_s3 = sshll.u32 (!%p137_p3), %s581_s9, 2 }
   0x7   : > { %140 = sbr.rel (%p137_p3) target bundleno = 208 (0xd0), region = 28  ;;  %p678_p4 = scmp.lt.s32.totalorder (!%p137_p3), %s524_s3, 7 }
   0xc   : > { %v291_v0 = vld [vmem:[%s859_s1 + $0x178] sm:$0xff]  ;;  %v290_v1 = vld [vmem:[%s859_s1 + $0x170] sm:$0xff]  ;;  %v289_v5 = vld [vmem:[%s859_s1 + $0x168] sm:$0xff]  ;;  %s867_s3 = smov (!%p678_p4, %s524_s3), 7 }
   0xd   : > { %v307_v2 = vld [vmem:[%s859_s1 + $0x1f8] sm:$0xff]  ;;  %366 = vmatpush.msra.mxu2 %v291_v0  ;;  %v306_v6 = vld [vmem:[%s859_s1 + $0x1f0] sm:$0xff]  ;;  %v305_v9 = vld [vmem:[%s859_s1 + $0x1e8] sm:$0xff]  ;;  %s525_s4 = sshll.u32 %s867_s3, 3 }
   0xe   : > { %395 = vmatpush.msra.mxu3 %v307_v2  ;;  %v259_v3 = vld [vmem:[%s859_s1 + $0x78] sm:$0xff]  ;;  %v258_v7 = vld [vmem:[%s859_s1 + $0x70] sm:$0xff]  ;;  %v257_v10 = vld [vmem:[%s859_s1 + $0x68] sm:$0xff]  ;;  %s760_s22 = scalar_lea.vmem %s858_s0, %s525_s4  ;;  %s182_s6 = scalar_lea.vmem %s860_s2, %s525_s4 }
   0xf   : > { %v275_v4 = vld [vmem:[%s859_s1 + $0xf8] sm:$0xff]  ;;  %308 = vmatpush.msra.mxu0 %v259_v3  ;;  %v274_v8 = vld [vmem:[%s859_s1 + $0xf0] sm:$0xff]  ;;  %367 = vmatpush.msra.mxu2 %v290_v1  ;;  %v288_v11 = vld [vmem:[%s859_s1 + $0x160] sm:$0xff] }
  0x10   : > { %337 = vmatpush.msra.mxu1 %v275_v4  ;;  %396 = vmatpush.msra.mxu3 %v306_v6  ;;  %v273_v12 = vld [vmem:[%s859_s1 + $0xe8] sm:$0xff]  ;;  %v304_v13 = vld [vmem:[%s859_s1 + $0x1e0] sm:$0xff]  ;;  %v287_v16 = vld [vmem:[%s859_s1 + $0x158] sm:$0xff] }
  0x11   : > { %309 = vmatpush.msra.mxu0 %v258_v7  ;;  %368 = vmatpush.msra.mxu2 %v289_v5  ;;  %v256_v14 = vld [vmem:[%s859_s1 + $0x60] sm:$0xff]  ;;  %v303_v17 = vld [vmem:[%s859_s1 + $0x1d8] sm:$0xff]  ;;  %v286_v20 = vld [vmem:[%s859_s1 + $0x150] sm:$0xff] }
  0x12   : > { %338 = vmatpush.msra.mxu1 %v274_v8  ;;  %397 = vmatpush.msra.mxu3 %v305_v9  ;;  %v272_v15 = vld [vmem:[%s859_s1 + $0xe0] sm:$0xff]  ;;  %v255_v18 = vld [vmem:[%s859_s1 + $0x58] sm:$0xff]  ;;  %v302_v21 = vld [vmem:[%s859_s1 + $0x1d0] sm:$0xff] }
  0x13   : > { %310 = vmatpush.msra.mxu0 %v257_v10  ;;  %369 = vmatpush.msra.mxu2 %v288_v11  ;;  %v271_v19 = vld [vmem:[%s859_s1 + $0xd8] sm:$0xff]  ;;  %v254_v22 = vld [vmem:[%s859_s1 + $0x50] sm:$0xff]  ;;  %v285_v24 = vld [vmem:[%s859_s1 + $0x148] sm:$0xff] }
  0x14   : > { %339 = vmatpush.msra.mxu1 %v273_v12  ;;  %398 = vmatpush.msra.mxu3 %v304_v13  ;;  %v270_v23 = vld [vmem:[%s859_s1 + $0xd0] sm:$0xff]  ;;  %v301_v25 = vld [vmem:[%s859_s1 + $0x1c8] sm:$0xff]  ;;  %v284_v28 = vld [vmem:[%s859_s1 + $0x140] sm:$0xff]  ;;  %v591_v12 = vmov 1.0  }
  0x15   : > { %311 = vmatpush.msra.mxu0 %v256_v14  ;;  %370 = vmatpush.msra.mxu2 %v287_v16  ;;  %v253_v26 = vld [vmem:[%s859_s1 + $0x48] sm:$0xff]  ;;  %v300_v29 = vld [vmem:[%s859_s1 + $0x1c0] sm:$0xff]  ;;  %v283_v32 = vld [vmem:[%s859_s1 + $0x138] sm:$0xff] }
  0x16   : > { %340 = vmatpush.msra.mxu1 %v272_v15  ;;  %399 = vmatpush.msra.mxu3 %v303_v17  ;;  %v269_v27 = vld [vmem:[%s859_s1 + $0xc8] sm:$0xff]  ;;  %v252_v30 = vld [vmem:[%s859_s1 + $0x40] sm:$0xff]  ;;  %v299_v33 = vld [vmem:[%s859_s1 + $0x1b8] sm:$0xff] }
  0x17   : > { %312 = vmatpush.msra.mxu0 %v255_v18  ;;  %371 = vmatpush.msra.mxu2 %v286_v20  ;;  %v268_v31 = vld [vmem:[%s859_s1 + $0xc0] sm:$0xff]  ;;  %v251_v34 = vld [vmem:[%s859_s1 + $0x38] sm:$0xff]  ;;  %v282_v36 = vld [vmem:[%s859_s1 + $0x130] sm:$0xff] }
  0x18   : > { %341 = vmatpush.msra.mxu1 %v271_v19  ;;  %400 = vmatpush.msra.mxu3 %v302_v21  ;;  %v267_v35 = vld [vmem:[%s859_s1 + $0xb8] sm:$0xff]  ;;  %v298_v37 = vld [vmem:[%s859_s1 + $0x1b0] sm:$0xff]  ;;  %v281_v40 = vld [vmem:[%s859_s1 + $0x128] sm:$0xff] }
  0x19   : > { %313 = vmatpush.msra.mxu0 %v254_v22  ;;  %372 = vmatpush.msra.mxu2 %v285_v24  ;;  %v250_v38 = vld [vmem:[%s859_s1 + $0x30] sm:$0xff]  ;;  %v297_v41 = vld [vmem:[%s859_s1 + $0x1a8] sm:$0xff]  ;;  %v184_v44 = vld [vmem:[%s760_s22] sm:$0xff] }
  0x1a   : > { %342 = vmatpush.msra.mxu1 %v270_v23  ;;  %401 = vmatpush.msra.mxu3 %v301_v25  ;;  %v266_v39 = vld [vmem:[%s859_s1 + $0xb0] sm:$0xff]  ;;  %v249_v42 = vld [vmem:[%s859_s1 + $0x28] sm:$0xff]  ;;  %v280_v45 = vld [vmem:[%s859_s1 + $0x120] sm:$0xff]  ;;  %559 = vtanh.f32 %v184_v44 }
  0x1b   : > { %314 = vmatpush.msra.mxu0 %v253_v26  ;;  %373 = vmatpush.msra.mxu2 %v284_v28  ;;  %v265_v43 = vld [vmem:[%s859_s1 + $0xa8] sm:$0xff]  ;;  %v296_v46 = vld [vmem:[%s859_s1 + $0x1a0] sm:$0xff]  ;;  %v279_v50 = vld [vmem:[%s859_s1 + $0x118] sm:$0xff] }
  0x1c   : > { %343 = vmatpush.msra.mxu1 %v269_v27  ;;  %402 = vmatpush.msra.mxu3 %v300_v29  ;;  %v248_v47 = vld [vmem:[%s859_s1 + $0x20] sm:$0xff]  ;;  %v185_v49 = vld [vmem:[%s760_s22 + $0x8] sm:$0xff]  ;;  %v295_v51 = vld [vmem:[%s859_s1 + $0x198] sm:$0xff] }
  0x1d   : > { %315 = vmatpush.msra.mxu0 %v252_v30  ;;  %374 = vmatpush.msra.mxu2 %v283_v32  ;;  %v264_v48 = vld [vmem:[%s859_s1 + $0xa0] sm:$0xff]  ;;  %561 = vtanh.f32 %v185_v49  ;;  %v186_v52 = vld [vmem:[%s760_s22 + $0x10] sm:$0xff]  ;;  %v247_v53 = vld [vmem:[%s859_s1 + $0x18] sm:$0xff] }
  0x1e   : > { %344 = vmatpush.msra.mxu1 %v268_v31  ;;  %403 = vmatpush.msra.mxu3 %v299_v33  ;;  %v263_v54 = vld [vmem:[%s859_s1 + $0x98] sm:$0xff]  ;;  %v278_v55 = vld [vmem:[%s859_s1 + $0x110] sm:$0xff]  ;;  %563 = vtanh.f32 %v186_v52  ;;  %v277_v60 = vld [vmem:[%s859_s1 + $0x108] sm:$0xff] }
  0x1f   : > { %316 = vmatpush.msra.mxu0 %v251_v34  ;;  %375 = vmatpush.msra.mxu2 %v282_v36  ;;  %v294_v56 = vld [vmem:[%s859_s1 + $0x190] sm:$0xff]  ;;  %v293_v61 = vld [vmem:[%s859_s1 + $0x188] sm:$0xff]  ;;  %v276_v2 = vld [vmem:[%s859_s1 + $0x100] sm:$0xff] }
  0x20   : > { %345 = vmatpush.msra.mxu1 %v267_v35  ;;  %404 = vmatpush.msra.mxu3 %v298_v37  ;;  %v246_v57 = vld [vmem:[%s859_s1 + $0x10] sm:$0xff]  ;;  %v560_v59 = vpop.eup %559  ;;  %v245_v63 = vld [vmem:[%s859_s1 + $0x8] sm:$0xff]  ;;  %v292_v3 = vld [vmem:[%s859_s1 + $0x180] sm:$0xff] }
  0x21   : > { %317 = vmatpush.msra.mxu0 %v250_v38  ;;  %376 = vmatpush.msra.mxu2 %v281_v40  ;;  %v262_v58 = vld [vmem:[%s859_s1 + $0x90] sm:$0xff]  ;;  %v196_v62 = vmul.f32 2.0, %v560_v59  ;;  %v261_v0 = vld [vmem:[%s859_s1 + $0x88] sm:$0xff]  ;;  %v244_v5 = vld [vmem:[%s859_s1] sm:$0xff] }
  0x22   : > { %346 = vmatpush.msra.mxu1 %v266_v39  ;;  %405 = vmatpush.msra.mxu3 %v297_v41  ;;  %v187_v7 = vld [vmem:[%s760_s22 + $0x18] sm:$0xff]  ;;  %v260_v9 = vld [vmem:[%s859_s1 + $0x80] sm:$0xff] }
  0x23   : > { %318 = vmatpush.msra.mxu0 %v249_v42  ;;  %377 = vmatpush.msra.mxu2 %v280_v45  ;;  %v562_v1 = vpop.eup %561  ;;  %v200_v4 = vmul.f32 %v560_v59, %v196_v62  ;;  %565 = vtanh.f32 %v187_v7 }
  0x24   : > { %347 = vmatpush.msra.mxu1 %v265_v43  ;;  %406 = vmatpush.msra.mxu3 %v296_v46  ;;  %v197_v6 = vmul.f32 2.0, %v562_v1  ;;  %v564_v8 = vpop.eup %563 }
  0x25   : > { %319 = vmatpush.msra.mxu0 %v248_v47  ;;  %378 = vmatpush.msra.mxu2 %v279_v50  ;;  %v528_v10 = vadd.f32 -1.0, %v200_v4  ;;  %v198_v15 = vmul.f32 2.0, %v564_v8 }
  0x26   : > { %348 = vmatpush.msra.mxu1 %v264_v48  ;;  %407 = vmatpush.msra.mxu3 %v295_v51  ;;  %v201_v11 = vmul.f32 %v562_v1, %v197_v6 }
  0x27   : > { %320 = vmatpush.msra.mxu0 %v247_v53  ;;  %379 = vmatpush.msra.mxu2 %v278_v55  ;;  %v212_v13 = vmul.f32 %v528_v10, %v196_v62  ;;  %v202_v18 = vmul.f32 %v564_v8, %v198_v15 }
  0x28   : > { %349 = vmatpush.msra.mxu1 %v263_v54  ;;  %408 = vmatpush.msra.mxu3 %v294_v56  ;;  %v529_v14 = vadd.f32 -1.0, %v201_v11 }
  0x29   : > { %321 = vmatpush.msra.mxu0 %v246_v57  ;;  %380 = vmatpush.msra.mxu2 %v277_v60  ;;  %v216_v16 = vsub.f32 %v212_v13, %v560_v59  ;;  %v566_v19 = vpop.eup %565  ;;  %v530_v21 = vadd.f32 -1.0, %v202_v18 }
  0x2a   : > { %350 = vmatpush.msra.mxu1 %v262_v58  ;;  %409 = vmatpush.msra.mxu3 %v293_v61  ;;  %v213_v17 = vmul.f32 %v529_v14, %v197_v6  ;;  %v199_v22 = vmul.f32 2.0, %v566_v19 }
  0x2b   : > { %322 = vmatpush.msra.mxu0 %v245_v63  ;;  %381 = vmatpush.msra.mxu2 %v276_v2  ;;  %v214_v23 = vmul.f32 %v530_v21, %v198_v15 }
  0x2c   : > { %351 = vmatpush.msra.mxu1 %v261_v0  ;;  %410 = vmatpush.msra.mxu3 %v292_v3  ;;  %v217_v20 = vsub.f32 %v213_v17, %v562_v1  ;;  %v203_v24 = vmul.f32 %v566_v19, %v199_v22 }
  0x2d   : > { %411 = vmatmul.f32.vlgmr.msra.gmra.mxu3 %v591_v12  ;;  %323 = vmatpush.msra.mxu0 %v244_v5  ;;  %v218_v25 = vsub.f32 %v214_v23, %v564_v8 }
  0x2e   : > { %352 = vmatpush.msra.mxu1 %v260_v9  ;;  %324 = vmatmul.f32.vlgmr.msra.gmra.mxu0 %v560_v59  ;;  %v531_v26 = vadd.f32 -1.0, %v203_v24 }
  0x2f   : > { %353 = vmatmul.f32.vlgmr.msra.gmra.mxu1 %v528_v10  ;;  %382 = vmatmul.f32.vlgmr.msra.gmra.mxu2 %v216_v16 }
  0x30   : > { %v215_v27 = vmul.f32 %v531_v26, %v199_v22 }
  0x32   : > { %v219_v28 = vsub.f32 %v215_v27, %v566_v19 }
  0x35   : > { %414 = vmatmul.f32.gmra.mxu3 %v591_v12 }
  0x36   : > { %327 = vmatmul.f32.gmra.mxu0 %v562_v1 }
  0x37   : > { %356 = vmatmul.f32.gmra.mxu1 %v529_v14  ;;  %385 = vmatmul.f32.gmra.mxu2 %v217_v20 }
  0x3d   : > { %417 = vmatmul.f32.gmra.mxu3 %v591_v12 }
  0x3e   : > { %330 = vmatmul.f32.gmra.mxu0 %v564_v8 }
  0x3f   : > { %359 = vmatmul.f32.gmra.mxu1 %v530_v21  ;;  %388 = vmatmul.f32.gmra.mxu2 %v218_v25 }
  0x45   : > { %420 = vmatmul.f32.gmra.mxu3 %v591_v12 }
  0x46   : > { %333 = vmatmul.f32.gmra.mxu0 %v566_v19 }
  0x47   : > { %362 = vmatmul.f32.gmra.mxu1 %v531_v26  ;;  %391 = vmatmul.f32.gmra.mxu2 %v219_v28 }
  0xab   : > { %v325_v29 = vpop.f32.mrf.mxu0 }
  0xac   : > { %v354_v30 = vpop.f32.mrf.mxu1 }
  0xad   : > { %v355_v32 = vadd.f32 %v354_v30, %v325_v29 }
  0xb0   : > { %v412_v31 = vpop.f32.mrf.mxu3 }
  0xb2   : > { %v383_v35 = vpop.f32.mrf.mxu2 }
  0xb3   : > { %v328_v33 = vpop.f32.mrf.mxu0  ;;  %v384_v36 = vadd.f32 %v383_v35, %v355_v32 }
  0xb4   : > { %v357_v34 = vpop.f32.mrf.mxu1 }
  0xb5   : > { %v413_v37 = vadd.f32 %v412_v31, %v384_v36  ;;  %v358_v39 = vadd.f32 %v357_v34, %v328_v33 }
  0xb7   : > { %424 = vst [vmem:[%s182_s6] sm:$0xff] %v413_v37 }
  0xb8   : > { %v415_v38 = vpop.f32.mrf.mxu3 }
  0xba   : > { %v386_v41 = vpop.f32.mrf.mxu2 }
  0xbb   : > { %v331_v40 = vpop.f32.mrf.mxu0  ;;  %v387_v43 = vadd.f32 %v386_v41, %v358_v39 }
  0xbc   : > { %v360_v42 = vpop.f32.mrf.mxu1 }
  0xbd   : > { %v416_v44 = vadd.f32 %v415_v38, %v387_v43  ;;  %v361_v45 = vadd.f32 %v360_v42, %v331_v40 }
  0xbf   : > { %425 = vst [vmem:[%s182_s6 + $0x8] sm:$0xff] %v416_v44 }
  0xc0   : > { %v418_v46 = vpop.f32.mrf.mxu3 }
  0xc2   : > { %v389_v47 = vpop.f32.mrf.mxu2 }
  0xc3   : > { %v390_v48 = vadd.f32 %v389_v47, %v361_v45  ;;  %v334_v49 = vpop.f32.mrf.mxu0 }
  0xc4   : > { %v363_v50 = vpop.f32.mrf.mxu1 }
  0xc5   : > { %v419_v51 = vadd.f32 %v418_v46, %v390_v48  ;;  %v364_v52 = vadd.f32 %v363_v50, %v334_v49 }
  0xc7   : > { %426 = vst [vmem:[%s182_s6 + $0x10] sm:$0xff] %v419_v51 }
  0xc8   : > { %v421_v54 = vpop.f32.mrf.mxu3 }
  0xca   : > { %v392_v53 = vpop.f32.mrf.mxu2 }
  0xcb   : > { %v393_v55 = vadd.f32 %v392_v53, %v364_v52 }
  0xcd   : > { %v422_v56 = vadd.f32 %v421_v54, %v393_v55 }
  0xcf   : > { %427 = vst [vmem:[%s182_s6 + $0x18] sm:$0xff] %v422_v56 }
  0xd0 PF: > { %s12_s11 = sadd.s32 1, %s589_s11   ;;  %s862_s9 = smov %s585_s10 }
  0xd1   : > { %p9_p5 = scmp.ge.s32.totalorder %s12_s11, 4   ;;  %s863_s10 = smov %s865_s12 }
  0xd3   :  { %11 = sbr.rel (!%p9_p5) target bundleno = 2 (0x2), region = 61 }

</bundles_post_ra>
